<compile_context>
chip_gen: v7x
topology: tpu7x:2x2x1
jax: 0.10.0
libtpu: 0.0.40
codegen_flags: <defaults>
</compile_context>

<pallas_src>
import jax
import jax.numpy as jnp
from jax.experimental import pallas as pl
from jax.experimental.pallas import tpu as pltpu

NUM_EMBEDDINGS = 10
EMBEDDING_DIM = 128
_TABLE_ROWS_PADDED = 16            # pad table rows to a sublane multiple (8)
_MAX_TILE = 8192                   # flattened-token rows per grid step
_VMEM_LIMIT_BYTES = 40 * 1024 * 1024


def _embedding_kernel(idx_ref, w_ref, o_ref):
    # idx_ref: (TILE, 1) int32
    # w_ref:   (16, 128) weight dtype (VMEM-resident across the whole grid)
    # o_ref:   (TILE, 128) weight dtype
    tile = idx_ref.shape[0]
    idx = idx_ref[...]                                               # (TILE, 1)

    # One-hot gather on the MXU.
    row_iota = jax.lax.broadcasted_iota(
        jnp.int32, (tile, _TABLE_ROWS_PADDED), 1)                    # (TILE, 16)
    onehot = (row_iota == idx).astype(jnp.float32)                   # (TILE, 16)
    w = w_ref[...].astype(jnp.float32)                               # (16, 128)

    out = jnp.dot(
        onehot, w,
        precision=jax.lax.Precision.HIGHEST,   # exact: one nonzero per row
        preferred_element_type=jnp.float32,
    )                                                                # (TILE, 128)
    o_ref[...] = out.astype(o_ref.dtype)


def _round_up(x, m):
    return ((x + m - 1) // m) * m


def embedding_forward(x, weight):
    """x: integer index array (any shape). weight: (NUM_EMBEDDINGS, EMBEDDING_DIM)."""
    orig_shape = x.shape
    out_dtype = weight.dtype
    idx_flat = x.reshape(-1).astype(jnp.int32)
    n = idx_flat.shape[0]
    idx_2d = idx_flat.reshape(n, 1)

    # Pad the tiny table to a sublane multiple once (10 -> 16 rows, ~8 KiB).
    w_padded = jnp.pad(
        weight, ((0, _TABLE_ROWS_PADDED - NUM_EMBEDDINGS), (0, 0)))

    tile = min(_MAX_TILE, _round_up(n, 8))
    grid = (pl.cdiv(n, tile),)

    out_itemsize = jnp.dtype(out_dtype).itemsize
    cost = pl.CostEstimate(
        flops=2 * n * _TABLE_ROWS_PADDED * EMBEDDING_DIM,
        transcendentals=0,
        bytes_accessed=(
            n * 4
            + n * EMBEDDING_DIM * out_itemsize
            + _TABLE_ROWS_PADDED * EMBEDDING_DIM * out_itemsize
        ),
    )

    out = pl.pallas_call(
        _embedding_kernel,
        out_shape=jax.ShapeDtypeStruct((n, EMBEDDING_DIM), out_dtype),
        grid=grid,
        in_specs=[
            pl.BlockSpec((tile, 1), lambda i: (i, 0)),
            pl.BlockSpec((_TABLE_ROWS_PADDED, EMBEDDING_DIM), lambda i: (0, 0)),
        ],
        out_specs=pl.BlockSpec((tile, EMBEDDING_DIM), lambda i: (i, 0)),
        compiler_params=pltpu.CompilerParams(
            dimension_semantics=("parallel",),
            vmem_limit_bytes=_VMEM_LIMIT_BYTES,
        ),
        cost_estimate=cost,
    )(idx_2d, w_padded)

    return out.reshape(orig_shape + (EMBEDDING_DIM,))


if __name__ == "__main__":
    key = jax.random.PRNGKey(0)
    k_idx, k_w, k_idx2 = jax.random.split(key, 3)

    # nn.Embedding default init is N(0, 1)
    weight = jax.random.normal(k_w, (NUM_EMBEDDINGS, EMBEDDING_DIM), dtype=jnp.float32)

    # small example input consistent with the module: batch=2, seq=8
    x = jax.random.randint(k_idx, (2, 8), 0, NUM_EMBEDDINGS, dtype=jnp.int32)
    y = jax.block_until_ready(embedding_forward(x, weight))
    ref = weight[x]
    assert y.shape == (2, 8, EMBEDDING_DIM), y.shape
    assert y.dtype == weight.dtype, y.dtype
    assert jnp.allclose(y, ref, atol=1e-6), "mismatch vs reference gather (small)"

    # second check: exercises a multi-step grid and the masked partial tail block
    x2 = jax.random.randint(k_idx2, (3, 3001), 0, NUM_EMBEDDINGS, dtype=jnp.int32)
    y2 = jax.block_until_ready(embedding_forward(x2, weight))
    ref2 = weight[x2]
    assert y2.shape == (3, 3001, EMBEDDING_DIM), y2.shape
    assert jnp.allclose(y2, ref2, atol=1e-6), "mismatch vs reference gather (tiled)"

    print("KERNEL_OK")
</pallas_src>

<mosaic_0001>
module attributes {stable_mosaic.version = 11 : i64} {
  func.func @_embedding_kernel(%arg0: i32, %arg1: memref<16x1xi32, #tpu.memory_space<vmem>>, %arg2: memref<16x128xf32, #tpu.memory_space<vmem>>, %arg3: memref<16x128xf32, #tpu.memory_space<vmem>>) attributes {dimension_semantics = [#tpu.dimension_semantics<parallel>], iteration_bounds = array<i64: 1>, scalar_prefetch = 0 : i64, scratch_operands = 0 : i64, tpu.core_type = #tpu.core_type<tc>, window_params = [{transform_indices = @transform_0, window_bounds = array<i64: 16, 1>}, {pipeline_mode = #tpu.pipeline_mode<synchronous>, transform_indices = @transform_1, window_bounds = array<i64: 16, 128>}, {transform_indices = @transform_2, window_bounds = array<i64: 16, 128>}]} {
    %c0 = arith.constant 0 : index
    %c0_0 = arith.constant 0 : index
    %0 = vector.load %arg1[%c0, %c0_0] : memref<16x1xi32, #tpu.memory_space<vmem>>, vector<16x1xi32>
    %1 = tpu.iota {dimensions = array<i32: 1>} : vector<16x16xi32>
    %2 = vector.broadcast %0 : vector<16x1xi32> to vector<16x16xi32>
    %3 = arith.cmpi eq, %1, %2 : vector<16x16xi32>
    %4 = arith.extui %3 : vector<16x16xi1> to vector<16x16xi32>
    %5 = arith.sitofp %4 : vector<16x16xi32> to vector<16x16xf32>
    %c0_1 = arith.constant 0 : index
    %c0_2 = arith.constant 0 : index
    %6 = vector.load %arg2[%c0_1, %c0_2] : memref<16x128xf32, #tpu.memory_space<vmem>>, vector<16x128xf32>
    %cst = arith.constant dense<0.000000e+00> : vector<16x128xf32>
    %7 = tpu.matmul %5, %6, %cst {dimension_numbers = #tpu.dot_dimension_numbers<[1], [0], [0], [1], [0, 0, 1, 1], [], []>, precision = #tpu.contract_precision<fp32>} : vector<16x16xf32>, vector<16x128xf32>, vector<16x128xf32> -> vector<16x128xf32>
    %c0_3 = arith.constant 0 : index
    %c0_4 = arith.constant 0 : index
    %8 = vector.load %arg3[%c0_3, %c0_4] : memref<16x128xf32, #tpu.memory_space<vmem>>, vector<16x128xf32>
    tpu.vector_store %arg3[%c0_3, %c0_4], %7 {strides = array<i32>} : memref<16x128xf32, #tpu.memory_space<vmem>>, vector<16x128xf32>,
    return
  }
  func.func @transform_0(%arg0: i32) -> (i32, i32) {
    %c0_i32 = arith.constant 0 : i32
    %c0_i32_0 = arith.constant 0 : i32
    return %arg0, %c0_i32 : i32, i32
  }
  func.func @transform_1(%arg0: i32) -> (i32, i32) {
    %c0_i32 = arith.constant 0 : i32
    %c0_i32_0 = arith.constant 0 : i32
    %c0_i32_1 = arith.constant 0 : i32
    return %c0_i32, %c0_i32_0 : i32, i32
  }
  func.func @transform_2(%arg0: i32) -> (i32, i32) {
    %c0_i32 = arith.constant 0 : i32
    %c0_i32_0 = arith.constant 0 : i32
    return %arg0, %c0_i32 : i32, i32
  }
}

</mosaic_0001>

<bundles_post_ra>
// kernel: tpu_custom_call.1
= control target key start
LH: loop header
LB: loop body
LE: loop exit
PB: predicated region body
PF: predicated region fallthrough
CT: control target
= control target key end

     0   :  { %v695_v1 = vmov 0   ;;  %s747_s0 = inlined_call_operand.vmem [shape: s32[16,1], index: 0, kind: input, shape index: {}]   ;;  %s748_s1 = inlined_call_operand.vmem [shape: f32[16,128], index: 1, kind: input, shape index: {}]   ;;  %s749_s2 = inlined_call_operand.hbm [shape: f32[16,128], index: 2, kind: output, shape index: {}]  }
   0x1   :  { %v12_v0 = vld [vmem:[%s747_s0] sm:$0xff]  ;;  %670 = vset.pattern.permute.xlu0 %v695_v1 }
   0x2   :  { %7 = vsyncpa [#allocation3], 0  ;;  %17 = vperm.xlu0 %670, %v12_v0   ;;  %v13_v2 = vld [vmem:[%s747_s0 + $0x8] sm:$0xff]  ;;  %v28_v3 = vld [vmem:[%s748_s1] sm:$0xff]  ;;  %v14_v19 = vlaneseq  ;;  %vm30_vm0 = vcmask 130048   ;;  %v696_v22 = vmov 0.0  }
   0x3   :  { %v29_v4 = vld [vmem:[%s748_s1 + $0x8] sm:$0xff]  ;;  %v38_v5 = vand.u32 4294901760, %v28_v3  ;;  %s697_s0 = smov [#allocation2]  }
   0x4   :  { %v41_v6 = vand.u32 4294901760, %v29_v4  ;;  %v15_v20 = vand.u32 127, %v14_v19  ;;  %s546_s1 = sshll.u32 %s697_s0, 4  ;;  %s547_s1 = int_to_ptr.vmem [resolvable:$true] %s546_s1 }
   0x5   :  { %v126_v8 = vsub.f32 %v28_v3, %v38_v5  ;;  %s671_s17 = scalar_lea.vmem %s547_s1, 256  ;;  %p676_p1 = scmp.lt.s32.totalorder %s547_s1, %s547_s1 }
   0x6   :  { %20 = vperm.xlu0 %670, %v13_v2   ;;  %v631_v7 = vpack.c.bf16 %v41_v6, %v38_v5  ;;  %v133_v9 = vsub.f32 %v29_v4, %v41_v6  ;;  %p672_p0 = scmp.ne.s32.totalorder %s547_s1, %s671_s17  ;;  %p677_p2 = scmp.lt.s32.totalorder %s671_s17, %s671_s17 }
   0x7   :  { %v127_v10 = vand.u32 4294901760, %v126_v8 }
   0x8   :  { %644 = vmatprep.subr.bf16.mxu0 %v631_v7  ;;  %632 = vmatprep.subr.bf16.mxu1 %v631_v7  ;;  %v134_v11 = vand.u32 4294901760, %v133_v9  ;;  %v639_v18 = vpack.c.bf16 %v133_v9, %v126_v8  ;;  %p678_p3 = por %p677_p2, %p676_p1 }
   0x9   :  { %646 = vmatpush3.bf16.msra.mxu0 %v631_v7  ;;  %634 = vmatpush3.bf16.msra.mxu1 %v631_v7  ;;  %v128_v12 = vsub.f32 %v126_v8, %v127_v10 }
   0xa   :  { %v135_v13 = vsub.f32 %v133_v9, %v134_v11  ;;  %v647_v14 = vpack.c.bf16 %v134_v11, %v127_v10  ;;  %p679_p4 = pnand %p678_p3, %p672_p0 }
   0xb   :  { %v129_v15 = vand.u32 4294901760, %v128_v12 }
   0xc   :  { %v136_v16 = vand.u32 4294901760, %v135_v13  ;;  %648 = vmatprep.subr.bf16.mxu0 %v647_v14 }
   0xe   :  { %v635_v17 = vpack.c.bf16 %v136_v16, %v129_v15 }
  0x10   :  { %636 = vmatprep.subr.bf16.mxu1 %v635_v17 }
  0x81   :  { %v18_v21 = vpop.permute.xlu0 %17 }
  0x82   :  { %vm22_vm1 = vcmp.eq.s32.totalorder %v15_v20, %v18_v21 }
  0x83   :  { %v557_v23 = vsel %vm22_vm1, 1.0, %v696_v22 }
  0x84   :  { %v32_v24 = vsel %vm30_vm0, %v557_v23, 0 }
  0x85   :  { %v105_v25 = vsub.f32 %v32_v24, %v32_v24  ;;  %v21_v26 = vpop.permute.xlu0 %20 }
  0x86   :  { %vm23_vm2 = vcmp.eq.s32.totalorder %v15_v20, %v21_v26 }
  0x87   :  { %v558_v27 = vsel %vm23_vm2, 1.0, %v696_v22  ;;  %v106_v28 = vand.u32 4294901760, %v105_v25 }
  0x88   :  { %v35_v29 = vsel %vm30_vm0, %v558_v27, 0 }
  0x89   :  { %v115_v30 = vsub.f32 %v35_v29, %v35_v29  ;;  %614 = vmatprep.mubr.f32.mxu0 %v106_v28  ;;  %v107_v31 = vsub.f32 %v105_v25, %v106_v28 }
  0x8b   :  { %v108_v32 = vand.u32 4294901760, %v107_v31  ;;  %v116_v33 = vand.u32 4294901760, %v115_v30 }
  0x8d   :  { %593 = vmatprep.mubr.f32.mxu1 %v108_v32  ;;  %615 = vmatmul.mubr.f32.vlgmr.msra.gmra.mrb[0].mxu0 %v116_v33  ;;  %v117_v34 = vsub.f32 %v115_v30, %v116_v33 }
  0x8e   :  { %621 = vmatprep.mubr.msk.f32.mxu0 %vm30_vm0, %v557_v23  ;;  %650 = vmatpush3.bf16.msra.mxu0 %v647_v14 }
  0x8f   :  { %v118_v35 = vand.u32 4294901760, %v117_v34  ;;  %652 = vmatprep.subr.bf16.mxu0 %v631_v7 }
  0x91   :  { %594 = vmatmul.mubr.f32.vlgmr.msra.gmra.mrb[0].mxu1 %v118_v35 }
  0x92   :  { %638 = vmatpush3.bf16.msra.mxu1 %v635_v17  ;;  %600 = vmatprep.mubr.msk.f32.mxu1 %vm30_vm0, %v557_v23 }
  0x93   :  { %640 = vmatprep.subr.bf16.mxu1 %v639_v18 }
  0x95   :  { %622 = vmatmul.mubr.msk.f32.vlgmr.msra.gmra.mrb[0].mxu0 %vm30_vm0, %v558_v27 }
  0x96   :  { %628 = vmatprep.mubr.msk.f32.mxu0 %vm30_vm0, %v557_v23  ;;  %654 = vmatpush3.bf16.msra.mxu0 %v631_v7 }
  0x99   :  { %601 = vmatmul.mubr.msk.f32.vlgmr.msra.gmra.mrb[0].mxu1 %vm30_vm0, %v558_v27 }
  0x9a   :  { %642 = vmatpush3.bf16.msra.mxu1 %v639_v18  ;;  %607 = vmatprep.mubr.f32.mxu1 %v105_v25 }
  0x9d   :  { %629 = vmatmul.mubr.msk.f32.vlgmr.msra.gmra.mrb[0].mxu0 %vm30_vm0, %v558_v27 }
  0xa1   :  { %608 = vmatmul.mubr.f32.vlgmr.msra.gmra.mrb[0].mxu1 %v115_v30 }
 0x170   :  { %v630_v36 = vpop.f32.mrb[0].mxu0 }
 0x171   :  { %v529_v37 = vpop.f32.mrb[1].mxu0 }
 0x174   :  { %v609_v38 = vpop.f32.mrb[0].mxu1 }
 0x175   :  { %v655_v39 = vadd.f32 %v630_v36, %v609_v38  ;;  %v283_v40 = vpop.f32.mrb[1].mxu1 }
 0x176   :  { %v656_v41 = vadd.f32 %v529_v37, %v283_v40 }
 0x177   :  { %540 = vst [vmem:[#allocation2 + $0x8] sm:$0xff] %v655_v39 }
 0x178   :  { %539 = vst [vmem:[#allocation2] sm:$0xff] %v656_v41 }
 0x179   :  { %682 = shalt.err (!%p679_p4)
}
 0x17a   :  { %s683_s20 = scalar_lea.hbm %s749_s2, 256 }
 0x17b   :  { %p684_p5 = scmp.ne.s32.totalorder %s749_s2, %s683_s20  ;;  %p687_p6 = scmp.lt.u32.totalorder %s683_s20, %s749_s2 }
 0x17d   :  { %p689_p7 = pnand %p687_p6, %p684_p5 }
 0x17f   :  { %692 = shalt.err (!%p689_p7)
}
 0x180   :  { %s698_s25 = smov 128   ;;  %s699_s26 = smov 8  }
 0x181   :  { %552 = dma.vmem_to_hbm [thread:$0]  %s547_s1, 256, %s749_s2, [#allocation3], %s698_s25, %s698_s25, %s699_s26  }
 0x182   :  { %693 = dma.done.wait [#allocation3], 256  }
 0x183   :  { %694 = vsyncadd [#allocation3], 4294967040 }
 0x184   :  { %556 = vsyncpa [#allocation3], 1 }

</bundles_post_ra>
